<compile_context>
chip_gen: v7x
topology: tpu7x:2x2x1
jax: 0.10.0
libtpu: 0.0.40
codegen_flags: <defaults>
</compile_context>

<pallas_src>
import jax
import jax.numpy as jnp
from jax.experimental import pallas as pl
from jax.experimental.pallas import tpu as pltpu


# ----------------------------------------------------------------------------
# Pallas kernel: tiled Y = relu(X @ W + b)   (bf16 inputs, f32 accumulate)
# ----------------------------------------------------------------------------
def _gemm_bias_relu_kernel(x_ref, w_ref, b_ref, o_ref, acc_ref):
    k = pl.program_id(2)

    @pl.when(k == 0)
    def _init():
        acc_ref[...] = jnp.zeros_like(acc_ref)

    # bf16 x bf16 -> f32 accumulate on the MXU.
    acc_ref[...] += jnp.dot(x_ref[...], w_ref[...],
                            preferred_element_type=jnp.float32)

    # Bias + ReLU only once the K reduction is complete (f32 epilogue).
    @pl.when(k == pl.num_programs(2) - 1)
    def _finalize():
        acc = acc_ref[...] + b_ref[...]          # broadcast bias over rows
        o_ref[...] = jnp.maximum(acc, 0.0).astype(o_ref.dtype)


def _round_up(x, m):
    return (x + m - 1) // m * m


def _pick_tile(dim, prefs):
    # Prefer 256-aligned tiles (v6e/v7x 256x256 MXU), fall back to 128 (v5e).
    for t in prefs:
        if dim % t == 0:
            return t
    return 128


def _pallas_gemm_bias_relu(x2d_bf16, w_bf16, b2d_f32):
    """x2d_bf16: [Mp, Kp] bf16, w_bf16: [Kp, Np] bf16, b2d_f32: [1, Np] f32.
    All padded dims are multiples of 128.  Returns [Mp, Np] f32."""
    Mp, Kp = x2d_bf16.shape
    Np = w_bf16.shape[1]

    tm = _pick_tile(Mp, (256, 128))
    tn = _pick_tile(Np, (256, 128))
    tk = _pick_tile(Kp, (512, 256, 128))
    grid = (Mp // tm, Np // tn, Kp // tk)

    return pl.pallas_call(
        _gemm_bias_relu_kernel,
        out_shape=jax.ShapeDtypeStruct((Mp, Np), jnp.float32),
        grid_spec=pltpu.PrefetchScalarGridSpec(
            num_scalar_prefetch=0,
            grid=grid,
            in_specs=[
                pl.BlockSpec((tm, tk), lambda i, j, k: (i, k)),
                pl.BlockSpec((tk, tn), lambda i, j, k: (k, j)),
                pl.BlockSpec((1, tn), lambda i, j, k: (0, j)),
            ],
            out_specs=pl.BlockSpec((tm, tn), lambda i, j, k: (i, j)),
            scratch_shapes=[pltpu.VMEM((tm, tn), jnp.float32)],
        ),
        compiler_params=pltpu.CompilerParams(
            # M/N tiles are independent -> shard across v7x's 2 TensorCores.
            dimension_semantics=("parallel", "parallel", "arbitrary"),
            # Stay well under v7x's 64 MiB physical VMEM.
            vmem_limit_bytes=48 * 1024 * 1024,
        ),
    )(x2d_bf16, w_bf16, b2d_f32)


# ----------------------------------------------------------------------------
# JAX-side mirror of the _OnnxModelFunction registry / module plumbing
# ----------------------------------------------------------------------------
class _OnnxModelFunctionJAX:
    id_object_map = {}     # model_id -> model params (the "onnx model")
    id_function_map = {}   # model_id -> jitted compiled callable


def create_model_function(model_params):
    _id = id(model_params)
    assert _id != 0, "internal error: the id of a Python object is 0."
    # Keeping the params in the registry also keeps them alive, so the id
    # cannot be recycled while the model is registered.
    _OnnxModelFunctionJAX.id_object_map[_id] = model_params
    return _id


def _build_model_func(params):
    """Compile the registered synthetic 'ONNX graph' (Gemm+Bias+Relu)."""
    w, b = params
    K, N = w.shape
    Kp = _round_up(K, 128)
    Np = _round_up(N, 128)

    # Pad weights/bias once at registration time; weights in bf16 for the MXU,
    # bias stays f32 for the epilogue.
    w_pad = jnp.pad(jnp.asarray(w, jnp.bfloat16), ((0, Kp - K), (0, Np - N)))
    b_pad = jnp.pad(jnp.asarray(b, jnp.float32), (0, Np - N)).reshape(1, Np)

    @jax.jit
    def func(x):
        lead = x.shape[:-1]
        x2d = x.reshape(-1, K)
        M = x2d.shape[0]
        Mp = _round_up(max(M, 128), 128)          # keep M >= 128 per launch
        x_pad = jnp.pad(x2d.astype(jnp.bfloat16),
                        ((0, Mp - M), (0, Kp - K)))
        y_pad = _pallas_gemm_bias_relu(x_pad, w_pad, b_pad)
        return y_pad[:M, :N].reshape(*lead, N)

    return func


def _invoke_onnx_model(model_id, *args):
    func = _OnnxModelFunctionJAX.id_function_map.get(model_id, None)
    if func is None:
        params = _OnnxModelFunctionJAX.id_object_map.get(model_id)
        if params is None:
            raise ValueError("cannot find id={} registered!".format(model_id))
        func = _build_model_func(params)
        _OnnxModelFunctionJAX.id_function_map[model_id] = func
    return func(*args)


class OnnxTracedModelFunctionJAX:
    def __init__(self, onnx_model_params):
        self.func_id = create_model_function(onnx_model_params)

    def __call__(self, *args):
        return _invoke_onnx_model(self.func_id, *args)


class OnnxModelModuleJAX:
    """JAX/Pallas analogue of _OnnxModelModule: forward == invoke wrapped model."""

    def __init__(self, mdl_params):
        self.function = OnnxTracedModelFunctionJAX(mdl_params)

    def __call__(self, *args):
        return self.function(*args)


# ----------------------------------------------------------------------------
# Main
# ----------------------------------------------------------------------------
if __name__ == "__main__":
    B, S, H = 2, 8, 32

    key = jax.random.PRNGKey(0)
    kx, kw, kb = jax.random.split(key, 3)

    # Deterministic synthetic "ONNX model" parameters: Gemm(H->H) + bias.
    w = (jax.random.normal(kw, (H, H), dtype=jnp.float32)
         / jnp.sqrt(jnp.float32(H)))
    b = jax.random.normal(kb, (H,), dtype=jnp.float32) * 0.1

    x = jax.random.normal(kx, (B, S, H), dtype=jnp.float32)

    module = OnnxModelModuleJAX((w, b))
    y = module(x)
    y = jax.block_until_ready(y)

    # correctness check against pure-JAX f32 reference (loose tolerance for
    # the bf16 MXU inputs; accumulation in the kernel is f32).
    ref = jnp.maximum(jnp.einsum("bsh,hk->bsk", x, w) + b, 0.0)
    assert y.shape == (B, S, H), y.shape
    assert jnp.allclose(y, ref, atol=3e-2, rtol=3e-2), "mismatch vs reference"

    print("KERNEL_OK")
</pallas_src>

<mosaic_0001>
module attributes {stable_mosaic.version = 11 : i64} {
  func.func @_gemm_bias_relu_kernel(%arg0: i32, %arg1: i32, %arg2: i32, %arg3: memref<128x128xbf16, #tpu.memory_space<vmem>>, %arg4: memref<128x128xbf16, #tpu.memory_space<vmem>>, %arg5: memref<1x128xf32, #tpu.memory_space<vmem>>, %arg6: memref<128x128xf32, #tpu.memory_space<vmem>>, %arg7: memref<128x128xf32, #tpu.memory_space<vmem>>) attributes {dimension_semantics = [#tpu.dimension_semantics<parallel>, #tpu.dimension_semantics<parallel>, #tpu.dimension_semantics<arbitrary>], iteration_bounds = array<i64: 1, 1, 1>, scalar_prefetch = 0 : i64, scratch_operands = 1 : i64, tpu.core_type = #tpu.core_type<tc>, window_params = [{transform_indices = @transform_0, window_bounds = array<i64: 128, 128>}, {transform_indices = @transform_1, window_bounds = array<i64: 128, 128>}, {transform_indices = @transform_2, window_bounds = array<i64: 1, 128>}, {transform_indices = @transform_3, window_bounds = array<i64: 128, 128>}]} {
    %c0_i32 = arith.constant 0 : i32
    %0 = arith.cmpi eq, %arg2, %c0_i32 : i32
    %1 = arith.extui %0 : i1 to i32
    %c0_i32_0 = arith.constant 0 : i32
    %2 = arith.cmpi ne, %1, %c0_i32_0 : i32
    scf.if %2 {
      %cst_10 = arith.constant 0.000000e+00 : f32
      %12 = vector.broadcast %cst_10 : f32 to vector<128x128xf32>
      %c0_11 = arith.constant 0 : index
      %c0_12 = arith.constant 0 : index
      %13 = vector.load %arg7[%c0_11, %c0_12] : memref<128x128xf32, #tpu.memory_space<vmem>>, vector<128x128xf32>
      tpu.vector_store %arg7[%c0_11, %c0_12], %12 {strides = array<i32>} : memref<128x128xf32, #tpu.memory_space<vmem>>, vector<128x128xf32>,
    } else {
    }
    %c0 = arith.constant 0 : index
    %c0_1 = arith.constant 0 : index
    %3 = vector.load %arg7[%c0, %c0_1] : memref<128x128xf32, #tpu.memory_space<vmem>>, vector<128x128xf32>
    %c0_2 = arith.constant 0 : index
    %c0_3 = arith.constant 0 : index
    %4 = vector.load %arg3[%c0_2, %c0_3] : memref<128x128xbf16, #tpu.memory_space<vmem>>, vector<128x128xbf16>
    %c0_4 = arith.constant 0 : index
    %c0_5 = arith.constant 0 : index
    %5 = vector.load %arg4[%c0_4, %c0_5] : memref<128x128xbf16, #tpu.memory_space<vmem>>, vector<128x128xbf16>
    %cst = arith.constant dense<0.000000e+00> : vector<128x128xf32>
    %6 = tpu.matmul %4, %5, %cst {dimension_numbers = #tpu.dot_dimension_numbers<[1], [0], [0], [1], [0, 0, 1, 1], [], []>} : vector<128x128xbf16>, vector<128x128xbf16>, vector<128x128xf32> -> vector<128x128xf32>
    %7 = arith.addf %3, %6 : vector<128x128xf32>
    %c0_6 = arith.constant 0 : index
    %c0_7 = arith.constant 0 : index
    %8 = vector.load %arg7[%c0_6, %c0_7] : memref<128x128xf32, #tpu.memory_space<vmem>>, vector<128x128xf32>
    tpu.vector_store %arg7[%c0_6, %c0_7], %7 {strides = array<i32>} : memref<128x128xf32, #tpu.memory_space<vmem>>, vector<128x128xf32>,
    %c0_i32_8 = arith.constant 0 : i32
    %9 = arith.cmpi eq, %arg2, %c0_i32_8 : i32
    %10 = arith.extui %9 : i1 to i32
    %c0_i32_9 = arith.constant 0 : i32
    %11 = arith.cmpi ne, %10, %c0_i32_9 : i32
    scf.if %11 {
      %c0_10 = arith.constant 0 : index
      %c0_11 = arith.constant 0 : index
      %12 = vector.load %arg7[%c0_10, %c0_11] : memref<128x128xf32, #tpu.memory_space<vmem>>, vector<128x128xf32>
      %c0_12 = arith.constant 0 : index
      %c0_13 = arith.constant 0 : index
      %13 = vector.load %arg5[%c0_12, %c0_13] : memref<1x128xf32, #tpu.memory_space<vmem>>, vector<1x128xf32>
      %14 = vector.broadcast %13 : vector<1x128xf32> to vector<128x128xf32>
      %15 = arith.addf %12, %14 : vector<128x128xf32>
      %cst_14 = arith.constant 0.000000e+00 : f32
      %16 = vector.broadcast %cst_14 : f32 to vector<128x128xf32>
      %17 = arith.maximumf %15, %16 : vector<128x128xf32>
      %c0_15 = arith.constant 0 : index
      %c0_16 = arith.constant 0 : index
      %18 = vector.load %arg6[%c0_15, %c0_16] : memref<128x128xf32, #tpu.memory_space<vmem>>, vector<128x128xf32>
      tpu.vector_store %arg6[%c0_15, %c0_16], %17 {strides = array<i32>} : memref<128x128xf32, #tpu.memory_space<vmem>>, vector<128x128xf32>,
    } else {
    }
    return
  }
  func.func @transform_0(%arg0: i32, %arg1: i32, %arg2: i32) -> (i32, i32) {
    %c0_i32 = arith.constant 0 : i32
    return %arg0, %arg2 : i32, i32
  }
  func.func @transform_1(%arg0: i32, %arg1: i32, %arg2: i32) -> (i32, i32) {
    %c0_i32 = arith.constant 0 : i32
    return %arg2, %arg1 : i32, i32
  }
  func.func @transform_2(%arg0: i32, %arg1: i32, %arg2: i32) -> (i32, i32) {
    %c0_i32 = arith.constant 0 : i32
    %c0_i32_0 = arith.constant 0 : i32
    return %c0_i32, %arg1 : i32, i32
  }
  func.func @transform_3(%arg0: i32, %arg1: i32, %arg2: i32) -> (i32, i32) {
    %c0_i32 = arith.constant 0 : i32
    return %arg0, %arg1 : i32, i32
  }
}

</mosaic_0001>

<bundles_post_ra>
// kernel: func.1
= control target key start
LH: loop header
LB: loop body
LE: loop exit
PB: predicated region body
PF: predicated region fallthrough
CT: control target
= control target key end

     0   :  { %s602_s1 = inlined_call_operand.vmem [shape: bf16[128,128], index: 1, kind: input, shape index: {}]   ;;  %s603_s0 = inlined_call_operand.vmem [shape: bf16[128,128], index: 0, kind: input, shape index: {}]   ;;  %s604_s2 = inlined_call_operand.vmem [shape: f32[1,128], index: 2, kind: input, shape index: {}]   ;;  %s605_s3 = inlined_call_operand.vmem [shape: f32[128,128], index: 3, kind: output, shape index: {}]  }
   0x1   :  { %v467_v0 = vld [vmem:[%s602_s1] sm:$0xff]   ;;  %v468_v1 = vld [vmem:[%s602_s1 + $0x8] sm:$0xff]   ;;  %v469_v2 = vld [vmem:[%s602_s1 + $0x10] sm:$0xff]  }
   0x2   :  { %419 = vmatprep.subr.bf16.mxu0 %v467_v0  ;;  %451 = vmatprep.subr.bf16.mxu1 %v467_v0  ;;  %v470_v3 = vld [vmem:[%s602_s1 + $0x18] sm:$0xff]   ;;  %v475_v4 = vld [vmem:[%s603_s0] sm:$0xff]   ;;  %v472_v7 = vld [vmem:[%s602_s1 + $0x28] sm:$0xff]  }
   0x3   :  { %420 = vmatpush3.bf16.msra.mxu0 %v467_v0  ;;  %459 = vmatpush3.bf16.msra.mxu1 %v467_v0  ;;  %v476_v5 = vld [vmem:[%s603_s0 + $0x20] sm:$0xff]   ;;  %v473_v8 = vld [vmem:[%s602_s1 + $0x30] sm:$0xff]   ;;  %v474_v9 = vld [vmem:[%s602_s1 + $0x38] sm:$0xff]  }
   0x4   :  { %421 = vmatprep.subr.bf16.mxu0 %v468_v1  ;;  %452 = vmatprep.subr.bf16.mxu1 %v468_v1  ;;  %v471_v6 = vld [vmem:[%s602_s1 + $0x20] sm:$0xff]   ;;  %v477_v10 = vld [vmem:[%s603_s0 + $0x8] sm:$0xff]   ;;  %v479_v12 = vld [vmem:[%s603_s0 + $0x10] sm:$0xff]  }
   0x5   :  { %435 = vmatprep.mubr.bf16.mxu0 %v475_v4  ;;  %443 = vmatprep.mubr.bf16.mxu1 %v476_v5  ;;  %v478_v11 = vld [vmem:[%s603_s0 + $0x28] sm:$0xff]   ;;  %v480_v13 = vld [vmem:[%s603_s0 + $0x30] sm:$0xff]   ;;  %v481_v14 = vld [vmem:[%s603_s0 + $0x18] sm:$0xff]  }
   0x6   :  { %v482_v15 = vld [vmem:[%s603_s0 + $0x38] sm:$0xff]   ;;  %v402_v16 = vld [vmem:[%s604_s2] ss:$0 sm:$0xff] }
   0x7   :  { %422 = vmatpush3.bf16.msra.mxu0 %v468_v1  ;;  %460 = vmatpush3.bf16.msra.mxu1 %v468_v1 }
   0x8   :  { %423 = vmatprep.subr.bf16.mxu0 %v469_v2  ;;  %453 = vmatprep.subr.bf16.mxu1 %v469_v2 }
   0xb   :  { %424 = vmatpush3.bf16.msra.mxu0 %v469_v2  ;;  %461 = vmatpush3.bf16.msra.mxu1 %v469_v2 }
   0xc   :  { %425 = vmatprep.subr.bf16.mxu0 %v470_v3  ;;  %454 = vmatprep.subr.bf16.mxu1 %v470_v3 }
   0xf   :  { %426 = vmatpush3.bf16.msra.mxu0 %v470_v3  ;;  %462 = vmatpush3.bf16.msra.mxu1 %v470_v3 }
  0x10   :  { %427 = vmatprep.subr.bf16.mxu0 %v471_v6  ;;  %455 = vmatprep.subr.bf16.mxu1 %v471_v6 }
  0x13   :  { %428 = vmatpush3.bf16.msra.mxu0 %v471_v6  ;;  %463 = vmatpush3.bf16.msra.mxu1 %v471_v6 }
  0x14   :  { %429 = vmatprep.subr.bf16.mxu0 %v472_v7  ;;  %456 = vmatprep.subr.bf16.mxu1 %v472_v7 }
  0x17   :  { %430 = vmatpush3.bf16.msra.mxu0 %v472_v7  ;;  %464 = vmatpush3.bf16.msra.mxu1 %v472_v7 }
  0x18   :  { %431 = vmatprep.subr.bf16.mxu0 %v473_v8  ;;  %457 = vmatprep.subr.bf16.mxu1 %v473_v8 }
  0x1b   :  { %432 = vmatpush3.bf16.msra.mxu0 %v473_v8  ;;  %465 = vmatpush3.bf16.msra.mxu1 %v473_v8 }
  0x1c   :  { %433 = vmatprep.subr.bf16.mxu0 %v474_v9  ;;  %458 = vmatprep.subr.bf16.mxu1 %v474_v9 }
  0x1f   :  { %434 = vmatpush3.bf16.msra.mxu0 %v474_v9  ;;  %466 = vmatpush3.bf16.msra.mxu1 %v474_v9 }
  0x22   :  { %436 = vmatmul.mubr.bf16.vlgmr.msra.gmra.mrb[0].mxu0 %v477_v10  ;;  %444 = vmatmul.mubr.bf16.vlgmr.msra.gmra.mrb[0].mxu1 %v478_v11 }
  0x23   :  { %439 = vmatprep.mubr.bf16.mxu0 %v479_v12  ;;  %447 = vmatprep.mubr.bf16.mxu1 %v480_v13 }
  0x2a   :  { %440 = vmatmul.mubr.bf16.gmra.mrb[4].mxu0 %v481_v14  ;;  %448 = vmatmul.mubr.bf16.gmra.mrb[4].mxu1 %v482_v15 }
  0xf5   :  { %v437_v17 = vpop.f32.mrb[0].mxu0  ;;  %v445_v18 = vpop.f32.mrb[0].mxu1 }
  0xf6   :  { %v336_v19 = vadd.f32 %v437_v17, %v402_v16  ;;  %v344_v20 = vadd.f32 %v445_v18, %v402_v16  ;;  %v213_v21 = vpop.f32.mrb[1].mxu0  ;;  %v245_v22 = vpop.f32.mrb[1].mxu1 }
  0xf7   :  { %v334_v23 = vadd.f32 %v402_v16, %v213_v21  ;;  %v342_v24 = vadd.f32 %v402_v16, %v245_v22  ;;  %v438_v25 = vpop.f32.mrb[2].mxu0  ;;  %v446_v26 = vpop.f32.mrb[2].mxu1 }
  0xf8   :  { %v352_v27 = vmax.f32 %v336_v19, 0.0  ;;  %v360_v28 = vmax.f32 %v344_v20, 0.0  ;;  %v337_v29 = vadd.f32 %v438_v25, %v402_v16  ;;  %v345_v30 = vadd.f32 %v446_v26, %v402_v16  ;;  %v216_v31 = vpop.f32.mrb[3].mxu0  ;;  %v248_v32 = vpop.f32.mrb[3].mxu1 }
  0xf9   :  { %v350_v33 = vmax.f32 %v334_v23, 0.0  ;;  %v358_v34 = vmax.f32 %v342_v24, 0.0  ;;  %v335_v35 = vadd.f32 %v402_v16, %v216_v31  ;;  %v343_v36 = vadd.f32 %v402_v16, %v248_v32 }
  0xfa   :  { %368 = vst [vmem:[%s605_s3 + $0x10] sm:$0xff] %v352_v27  ;;  %376 = vst [vmem:[%s605_s3 + $0x50] sm:$0xff] %v360_v28  ;;  %v353_v37 = vmax.f32 %v337_v29, 0.0  ;;  %v361_v38 = vmax.f32 %v345_v30, 0.0 }
  0xfb   :  { %366 = vst [vmem:[%s605_s3] sm:$0xff] %v350_v33  ;;  %374 = vst [vmem:[%s605_s3 + $0x40] sm:$0xff] %v358_v34  ;;  %v351_v39 = vmax.f32 %v335_v35, 0.0  ;;  %v359_v40 = vmax.f32 %v343_v36, 0.0 }
  0xfc   :  { %369 = vst [vmem:[%s605_s3 + $0x18] sm:$0xff] %v353_v37  ;;  %377 = vst [vmem:[%s605_s3 + $0x58] sm:$0xff] %v361_v38 }
  0xfd   :  { %367 = vst [vmem:[%s605_s3 + $0x8] sm:$0xff] %v351_v39  ;;  %375 = vst [vmem:[%s605_s3 + $0x48] sm:$0xff] %v359_v40  ;;  %v441_v41 = vpop.f32.mrb[4].mxu0  ;;  %v449_v42 = vpop.f32.mrb[4].mxu1 }
  0xfe   :  { %v340_v43 = vadd.f32 %v441_v41, %v402_v16  ;;  %v348_v44 = vadd.f32 %v449_v42, %v402_v16  ;;  %v229_v45 = vpop.f32.mrb[5].mxu0  ;;  %v261_v46 = vpop.f32.mrb[5].mxu1 }
  0xff   :  { %v338_v47 = vadd.f32 %v402_v16, %v229_v45  ;;  %v346_v48 = vadd.f32 %v402_v16, %v261_v46  ;;  %v442_v49 = vpop.f32.mrb[6].mxu0  ;;  %v450_v50 = vpop.f32.mrb[6].mxu1 }
 0x100   :  { %v356_v51 = vmax.f32 %v340_v43, 0.0  ;;  %v364_v52 = vmax.f32 %v348_v44, 0.0  ;;  %v341_v53 = vadd.f32 %v442_v49, %v402_v16  ;;  %v349_v54 = vadd.f32 %v450_v50, %v402_v16  ;;  %v232_v55 = vpop.f32.mrb[7].mxu0  ;;  %v264_v56 = vpop.f32.mrb[7].mxu1 }
 0x101   :  { %v354_v57 = vmax.f32 %v338_v47, 0.0  ;;  %v362_v58 = vmax.f32 %v346_v48, 0.0  ;;  %v339_v59 = vadd.f32 %v402_v16, %v232_v55  ;;  %v347_v60 = vadd.f32 %v402_v16, %v264_v56 }
 0x102   :  { %372 = vst [vmem:[%s605_s3 + $0x30] sm:$0xff] %v356_v51  ;;  %380 = vst [vmem:[%s605_s3 + $0x70] sm:$0xff] %v364_v52  ;;  %v357_v61 = vmax.f32 %v341_v53, 0.0  ;;  %v365_v62 = vmax.f32 %v349_v54, 0.0 }
 0x103   :  { %370 = vst [vmem:[%s605_s3 + $0x20] sm:$0xff] %v354_v57  ;;  %378 = vst [vmem:[%s605_s3 + $0x60] sm:$0xff] %v362_v58  ;;  %v355_v63 = vmax.f32 %v339_v59, 0.0  ;;  %v363_v0 = vmax.f32 %v347_v60, 0.0 }
 0x104   :  { %373 = vst [vmem:[%s605_s3 + $0x38] sm:$0xff] %v357_v61  ;;  %381 = vst [vmem:[%s605_s3 + $0x78] sm:$0xff] %v365_v62 }
 0x105   :  { %371 = vst [vmem:[%s605_s3 + $0x28] sm:$0xff] %v355_v63  ;;  %379 = vst [vmem:[%s605_s3 + $0x68] sm:$0xff] %v363_v0 }

</bundles_post_ra>
